<compile_context>
chip_gen: v7x
topology: tpu7x:2x2x1
jax: 0.10.0
libtpu: 0.0.40
codegen_flags: <defaults>
</compile_context>

<pallas_src>
import functools

import jax
import jax.numpy as jnp
from jax.experimental import pallas as pl
from jax.experimental.pallas import tpu as pltpu


OBS_DIM = 2       # np.array(env.observation_space.shape).prod() for MountainCar-v0
H1 = 120
H2 = 84
N_ACTIONS = 3     # env.action_space.n for MountainCar-v0

# Lane-aligned (zero-padded) sizes used inside the kernel.
H1P = 128
H2P = 128
AP = 128          # padded output lanes (lane-dense store; wrapper slices [:, :3])
TB_MAX = 512      # max batch-tile rows per grid step (tiny VMEM footprint, low pad waste)


def _qnet_kernel(x_ref, w1_ref, b1_ref, w2_ref, b2_ref, w3_ref, b3_ref, out_ref):
    x = x_ref[...]                                     # (TB, OBS_DIM) f32

    # Layer 1: contraction dim is only OBS_DIM(=2).  The MXU would pad K to
    # 128/256, so do it with broadcast multiply-adds on the VPU instead.
    h1 = b1_ref[...]                                   # (1, H1P), broadcasts over rows
    for f in range(OBS_DIM):                           # unrolled (OBS_DIM is static)
        h1 = h1 + x[:, f:f + 1] * w1_ref[f:f + 1, :]   # (TB, H1P)
    h1 = jnp.maximum(h1, 0.0)                          # ReLU

    # Layer 2: 128x128 MXU matmul, f32 accumulate.
    h2 = jnp.dot(h1, w2_ref[...], preferred_element_type=jnp.float32) + b2_ref[...]
    h2 = jnp.maximum(h2, 0.0)                          # (TB, H2P)

    # Layer 3: padded to 128 output lanes -> unmasked, lane-dense store.
    q = jnp.dot(h2, w3_ref[...], preferred_element_type=jnp.float32) + b3_ref[...]
    out_ref[...] = q                                   # (TB, AP)


def prepare_params(params):
    """Zero-pad parameters to lane-aligned shapes once (inert through ReLU / slicing)."""
    w1 = jnp.zeros((OBS_DIM, H1P), jnp.float32).at[:, :H1].set(params["w1"])
    b1 = jnp.zeros((1, H1P), jnp.float32).at[:, :H1].set(params["b1"])
    w2 = jnp.zeros((H1P, H2P), jnp.float32).at[:H1, :H2].set(params["w2"])
    b2 = jnp.zeros((1, H2P), jnp.float32).at[:, :H2].set(params["b2"])
    w3 = jnp.zeros((H2P, AP), jnp.float32).at[:H2, :N_ACTIONS].set(params["w3"])
    b3 = jnp.zeros((1, AP), jnp.float32).at[:, :N_ACTIONS].set(params["b3"])
    return (w1, b1, w2, b2, w3, b3)


def _round_up(a, m):
    return ((a + m - 1) // m) * m


@functools.partial(jax.jit, donate_argnums=())
def _forward_padded(x, w1, b1, w2, b2, w3, b3):
    """x: (B, OBS_DIM) f32, params already lane-padded.  Returns (B, N_ACTIONS)."""
    B = x.shape[0]

    # Batch tile: multiple of 8 sublanes, capped at TB_MAX; pad B so every
    # grid block is fully in-bounds (pad rows produce garbage Q-values that
    # are sliced away below).
    tb = min(TB_MAX, _round_up(B, 8))
    Bp = _round_up(B, tb)
    if Bp != B:
        x = jnp.pad(x, ((0, Bp - B), (0, 0)))
    grid = (Bp // tb,)

    resident = lambda i: (0, 0)   # weights/biases: same block every step -> stay in VMEM

    out = pl.pallas_call(
        _qnet_kernel,
        out_shape=jax.ShapeDtypeStruct((Bp, AP), jnp.float32),
        grid=grid,
        in_specs=[
            pl.BlockSpec((tb, OBS_DIM), lambda i: (i, 0)),   # x: tiled over batch
            pl.BlockSpec((OBS_DIM, H1P), resident),          # w1
            pl.BlockSpec((1, H1P), resident),                # b1
            pl.BlockSpec((H1P, H2P), resident),              # w2
            pl.BlockSpec((1, H2P), resident),                # b2
            pl.BlockSpec((H2P, AP), resident),               # w3
            pl.BlockSpec((1, AP), resident),                 # b3
        ],
        out_specs=pl.BlockSpec((tb, AP), lambda i: (i, 0)),
        compiler_params=pltpu.CompilerParams(
            dimension_semantics=("parallel",)),              # shard batch across TCs (v7x)
    )(x, w1, b1, w2, b2, w3, b3)

    return out[:B, :N_ACTIONS]


def qnetwork_forward(x, padded_params):
    """x: (B, OBS_DIM) f32.  padded_params: tuple from prepare_params()."""
    return _forward_padded(x, *padded_params)


def init_params(key):
    """Deterministic init matching PyTorch Linear default (U(-1/sqrt(fan_in), +))."""
    ks = jax.random.split(key, 6)

    def linear(kw, kb, fan_in, fan_out):
        bound = 1.0 / jnp.sqrt(jnp.float32(fan_in))
        w = jax.random.uniform(kw, (fan_in, fan_out), jnp.float32, -bound, bound)
        b = jax.random.uniform(kb, (fan_out,), jnp.float32, -bound, bound)
        return w, b

    w1, b1 = linear(ks[0], ks[1], OBS_DIM, H1)
    w2, b2 = linear(ks[2], ks[3], H1, H2)
    w3, b3 = linear(ks[4], ks[5], H2, N_ACTIONS)
    return {"w1": w1, "b1": b1, "w2": w2, "b2": b2, "w3": w3, "b3": b3}


def _reference_forward(x, p):
    h1 = jnp.maximum(x @ p["w1"] + p["b1"], 0.0)
    h2 = jnp.maximum(h1 @ p["w2"] + p["b2"], 0.0)
    return h2 @ p["w3"] + p["b3"]


if __name__ == "__main__":
    key = jax.random.PRNGKey(0)
    k_param, k_x, k_x2 = jax.random.split(key, 3)

    params = init_params(k_param)
    padded = prepare_params(params)   # pad once; reused across all forward calls

    # Acting-path batch (B=2), like MountainCar (position, velocity) observations.
    x_small = jax.random.uniform(k_x, (2, OBS_DIM), jnp.float32, -1.0, 1.0)
    out_small = jax.block_until_ready(qnetwork_forward(x_small, padded))
    ref_small = _reference_forward(x_small, params)
    assert out_small.shape == (2, N_ACTIONS)
    assert jnp.allclose(out_small, ref_small, atol=1e-5, rtol=1e-5)

    # Replay-batch path: exercises multi-step grid + batch padding (grid=(3,)).
    x_big = jax.random.uniform(k_x2, (1031, OBS_DIM), jnp.float32, -1.0, 1.0)
    out_big = jax.block_until_ready(qnetwork_forward(x_big, padded))
    ref_big = _reference_forward(x_big, params)
    assert out_big.shape == (1031, N_ACTIONS)
    assert jnp.allclose(out_big, ref_big, atol=1e-4, rtol=1e-4)

    print("KERNEL_OK")
</pallas_src>

<mosaic_0001>
module attributes {stable_mosaic.version = 11 : i64} {
  func.func @_qnet_kernel(%arg0: i32, %arg1: memref<8x2xf32, #tpu.memory_space<vmem>>, %arg2: memref<2x128xf32, #tpu.memory_space<vmem>>, %arg3: memref<1x128xf32, #tpu.memory_space<vmem>>, %arg4: memref<128x128xf32, #tpu.memory_space<vmem>>, %arg5: memref<1x128xf32, #tpu.memory_space<vmem>>, %arg6: memref<128x128xf32, #tpu.memory_space<vmem>>, %arg7: memref<1x128xf32, #tpu.memory_space<vmem>>, %arg8: memref<8x128xf32, #tpu.memory_space<vmem>>) attributes {dimension_semantics = [#tpu.dimension_semantics<parallel>], iteration_bounds = array<i64: 1>, scalar_prefetch = 0 : i64, scratch_operands = 0 : i64, tpu.core_type = #tpu.core_type<tc>, window_params = [{transform_indices = @transform_0, window_bounds = array<i64: 8, 2>}, {pipeline_mode = #tpu.pipeline_mode<synchronous>, transform_indices = @transform_1, window_bounds = array<i64: 2, 128>}, {pipeline_mode = #tpu.pipeline_mode<synchronous>, transform_indices = @transform_2, window_bounds = array<i64: 1, 128>}, {pipeline_mode = #tpu.pipeline_mode<synchronous>, transform_indices = @transform_3, window_bounds = array<i64: 128, 128>}, {pipeline_mode = #tpu.pipeline_mode<synchronous>, transform_indices = @transform_4, window_bounds = array<i64: 1, 128>}, {pipeline_mode = #tpu.pipeline_mode<synchronous>, transform_indices = @transform_5, window_bounds = array<i64: 128, 128>}, {pipeline_mode = #tpu.pipeline_mode<synchronous>, transform_indices = @transform_6, window_bounds = array<i64: 1, 128>}, {transform_indices = @transform_7, window_bounds = array<i64: 8, 128>}]} {
    %c0 = arith.constant 0 : index
    %c0_0 = arith.constant 0 : index
    %0 = vector.load %arg1[%c0, %c0_0] : memref<8x2xf32, #tpu.memory_space<vmem>>, vector<8x2xf32>
    %c0_1 = arith.constant 0 : index
    %c0_2 = arith.constant 0 : index
    %1 = vector.load %arg3[%c0_1, %c0_2] : memref<1x128xf32, #tpu.memory_space<vmem>>, vector<1x128xf32>
    %2 = vector.extract_strided_slice %0 {offsets = [0, 0], sizes = [8, 1], strides = [1, 1]} : vector<8x2xf32> to vector<8x1xf32>
    %c0_3 = arith.constant 0 : index
    %c0_4 = arith.constant 0 : index
    %3 = vector.load %arg2[%c0_3, %c0_4] : memref<2x128xf32, #tpu.memory_space<vmem>>, vector<1x128xf32>
    %4 = vector.broadcast %2 : vector<8x1xf32> to vector<8x128xf32>
    %5 = vector.broadcast %3 : vector<1x128xf32> to vector<8x128xf32>
    %6 = arith.mulf %4, %5 : vector<8x128xf32>
    %7 = vector.broadcast %1 : vector<1x128xf32> to vector<8x128xf32>
    %8 = arith.addf %7, %6 : vector<8x128xf32>
    %9 = vector.extract_strided_slice %0 {offsets = [0, 1], sizes = [8, 1], strides = [1, 1]} : vector<8x2xf32> to vector<8x1xf32>
    %c1 = arith.constant 1 : index
    %c0_5 = arith.constant 0 : index
    %10 = vector.load %arg2[%c1, %c0_5] : memref<2x128xf32, #tpu.memory_space<vmem>>, vector<1x128xf32>
    %11 = vector.broadcast %9 : vector<8x1xf32> to vector<8x128xf32>
    %12 = vector.broadcast %10 : vector<1x128xf32> to vector<8x128xf32>
    %13 = arith.mulf %11, %12 : vector<8x128xf32>
    %14 = arith.addf %8, %13 : vector<8x128xf32>
    %cst = arith.constant 0.000000e+00 : f32
    %15 = vector.broadcast %cst : f32 to vector<8x128xf32>
    %16 = arith.maximumf %14, %15 : vector<8x128xf32>
    %c0_6 = arith.constant 0 : index
    %c0_7 = arith.constant 0 : index
    %17 = vector.load %arg4[%c0_6, %c0_7] : memref<128x128xf32, #tpu.memory_space<vmem>>, vector<128x128xf32>
    %cst_8 = arith.constant dense<0.000000e+00> : vector<8x128xf32>
    %18 = tpu.matmul %16, %17, %cst_8 {dimension_numbers = #tpu.dot_dimension_numbers<[1], [0], [0], [1], [0, 0, 1, 1], [], []>} : vector<8x128xf32>, vector<128x128xf32>, vector<8x128xf32> -> vector<8x128xf32>
    %c0_9 = arith.constant 0 : index
    %c0_10 = arith.constant 0 : index
    %19 = vector.load %arg5[%c0_9, %c0_10] : memref<1x128xf32, #tpu.memory_space<vmem>>, vector<1x128xf32>
    %20 = vector.broadcast %19 : vector<1x128xf32> to vector<8x128xf32>
    %21 = arith.addf %18, %20 : vector<8x128xf32>
    %cst_11 = arith.constant 0.000000e+00 : f32
    %22 = vector.broadcast %cst_11 : f32 to vector<8x128xf32>
    %23 = arith.maximumf %21, %22 : vector<8x128xf32>
    %c0_12 = arith.constant 0 : index
    %c0_13 = arith.constant 0 : index
    %24 = vector.load %arg6[%c0_12, %c0_13] : memref<128x128xf32, #tpu.memory_space<vmem>>, vector<128x128xf32>
    %cst_14 = arith.constant dense<0.000000e+00> : vector<8x128xf32>
    %25 = tpu.matmul %23, %24, %cst_14 {dimension_numbers = #tpu.dot_dimension_numbers<[1], [0], [0], [1], [0, 0, 1, 1], [], []>} : vector<8x128xf32>, vector<128x128xf32>, vector<8x128xf32> -> vector<8x128xf32>
    %c0_15 = arith.constant 0 : index
    %c0_16 = arith.constant 0 : index
    %26 = vector.load %arg7[%c0_15, %c0_16] : memref<1x128xf32, #tpu.memory_space<vmem>>, vector<1x128xf32>
    %27 = vector.broadcast %26 : vector<1x128xf32> to vector<8x128xf32>
    %28 = arith.addf %25, %27 : vector<8x128xf32>
    %c0_17 = arith.constant 0 : index
    %c0_18 = arith.constant 0 : index
    %29 = vector.load %arg8[%c0_17, %c0_18] : memref<8x128xf32, #tpu.memory_space<vmem>>, vector<8x128xf32>
    tpu.vector_store %arg8[%c0_17, %c0_18], %28 {strides = array<i32>} : memref<8x128xf32, #tpu.memory_space<vmem>>, vector<8x128xf32>,
    return
  }
  func.func @transform_0(%arg0: i32) -> (i32, i32) {
    %c0_i32 = arith.constant 0 : i32
    %c0_i32_0 = arith.constant 0 : i32
    return %arg0, %c0_i32 : i32, i32
  }
  func.func @transform_1(%arg0: i32) -> (i32, i32) {
    %c0_i32 = arith.constant 0 : i32
    %c0_i32_0 = arith.constant 0 : i32
    %c0_i32_1 = arith.constant 0 : i32
    return %c0_i32, %c0_i32_0 : i32, i32
  }
  func.func @transform_2(%arg0: i32) -> (i32, i32) {
    %c0_i32 = arith.constant 0 : i32
    %c0_i32_0 = arith.constant 0 : i32
    %c0_i32_1 = arith.constant 0 : i32
    return %c0_i32, %c0_i32_0 : i32, i32
  }
  func.func @transform_3(%arg0: i32) -> (i32, i32) {
    %c0_i32 = arith.constant 0 : i32
    %c0_i32_0 = arith.constant 0 : i32
    %c0_i32_1 = arith.constant 0 : i32
    return %c0_i32, %c0_i32_0 : i32, i32
  }
  func.func @transform_4(%arg0: i32) -> (i32, i32) {
    %c0_i32 = arith.constant 0 : i32
    %c0_i32_0 = arith.constant 0 : i32
    %c0_i32_1 = arith.constant 0 : i32
    return %c0_i32, %c0_i32_0 : i32, i32
  }
  func.func @transform_5(%arg0: i32) -> (i32, i32) {
    %c0_i32 = arith.constant 0 : i32
    %c0_i32_0 = arith.constant 0 : i32
    %c0_i32_1 = arith.constant 0 : i32
    return %c0_i32, %c0_i32_0 : i32, i32
  }
  func.func @transform_6(%arg0: i32) -> (i32, i32) {
    %c0_i32 = arith.constant 0 : i32
    %c0_i32_0 = arith.constant 0 : i32
    %c0_i32_1 = arith.constant 0 : i32
    return %c0_i32, %c0_i32_0 : i32, i32
  }
  func.func @transform_7(%arg0: i32) -> (i32, i32) {
    %c0_i32 = arith.constant 0 : i32
    %c0_i32_0 = arith.constant 0 : i32
    return %arg0, %c0_i32 : i32, i32
  }
}

</mosaic_0001>

<bundles_post_ra>
// kernel: _forward_padded.1
= control target key start
LH: loop header
LB: loop body
LE: loop exit
PB: predicated region body
PF: predicated region fallthrough
CT: control target
= control target key end

     0   :  { %12 = vsyncpa [#allocation3], 0  ;;  %s606_s0 = inlined_call_operand.vmem [shape: f32[8,2], index: 0, kind: input, shape index: {}]   ;;  %s607_s1 = inlined_call_operand.vmem [shape: f32[2,128], index: 1, kind: input, shape index: {}]   ;;  %s608_s2 = inlined_call_operand.vmem [shape: f32[1,128], index: 2, kind: input, shape index: {}]   ;;  %s609_s3 = inlined_call_operand.hbm [shape: f32[128,128], index: 3, kind: input, shape index: {}]   ;;  %s610_s4 = inlined_call_operand.vmem [shape: f32[1,128], index: 4, kind: input, shape index: {}]   ;;  %s611_s5 = inlined_call_operand.hbm [shape: f32[128,128], index: 5, kind: input, shape index: {}]   ;;  %s612_s6 = inlined_call_operand.vmem [shape: f32[1,128], index: 6, kind: input, shape index: {}]   ;;  %s613_s7 = inlined_call_operand.vmem [shape: f32[8,128], index: 7, kind: output, shape index: {}]  }
   0x1   :  { %13 = vsyncpa [#allocation5], 0  ;;  %s496_s24 = smov [#allocation2]   ;;  %s448_s28 = scalar_lea.hbm %s609_s3, 2048 }
   0x2   :  { %s25_s25 = sshll.u32 %s496_s24, 4  ;;  %p449_p0 = scmp.ne.s32.totalorder %s609_s3, %s448_s28  ;;  %s26_s25 = int_to_ptr.vmem [resolvable:$true] %s25_s25 }
   0x3   :  { %p452_p1 = scmp.lt.u32.totalorder %s448_s28, %s609_s3 }
   0x5   :  { %p454_p2 = pnand %p452_p1, %p449_p0 }
   0x7   :  { %457 = shalt.err (!%p454_p2)
}
   0x8   :  { %s458_s10 = scalar_lea.vmem %s26_s25, 2048  ;;  %p463_p4 = scmp.lt.s32.totalorder %s26_s25, %s26_s25 }
   0x9   :  { %p459_p3 = scmp.ne.s32.totalorder %s26_s25, %s458_s10  ;;  %p464_p5 = scmp.lt.s32.totalorder %s458_s10, %s458_s10 }
   0xb   :  { %p465_p6 = por %p464_p5, %p463_p4 }
   0xd   :  { %p466_p7 = pnand %p465_p6, %p459_p3 }
   0xf   :  { %469 = shalt.err (!%p466_p7)
}
  0x10   :  { %s497_s11 = smov 128   ;;  %s498_s12 = smov 8  }
  0x11   :  { %31 = dma.hbm_to_vmem [thread:$0]  %s609_s3, 2048, %s26_s25, [#allocation3], %s497_s11, %s497_s11, %s498_s12  }
  0x12   :  { %s499_s15 = smov [#allocation4]   ;;  %s470_s19 = scalar_lea.hbm %s611_s5, 2048 }
  0x13   :  { %s39_s16 = sshll.u32 %s499_s15, 4  ;;  %p471_p8 = scmp.ne.s32.totalorder %s611_s5, %s470_s19  ;;  %s40_s16 = int_to_ptr.vmem [resolvable:$true] %s39_s16 }
  0x14   :  { %p474_p9 = scmp.lt.u32.totalorder %s470_s19, %s611_s5 }
  0x16   :  { %p476_p10 = pnand %p474_p9, %p471_p8 }
  0x18   :  { %479 = shalt.err (!%p476_p10)
}
  0x19   :  { %s480_s24 = scalar_lea.vmem %s40_s16, 2048  ;;  %p485_p12 = scmp.lt.s32.totalorder %s40_s16, %s40_s16 }
  0x1a   :  { %p481_p11 = scmp.ne.s32.totalorder %s40_s16, %s480_s24  ;;  %p486_p13 = scmp.lt.s32.totalorder %s480_s24, %s480_s24 }
  0x1c   :  { %p487_p0 = por %p486_p13, %p485_p12 }
  0x1e   :  { %p488_p1 = pnand %p487_p0, %p481_p11 }
  0x20   :  { %491 = shalt.err (!%p488_p1)
}
  0x21   :  { %45 = dma.hbm_to_vmem [thread:$0]  %s611_s5, 2048, %s40_s16, [#allocation5], %s497_s11, %s497_s11, %s498_s12  }
  0x22   :  { %492 = dma.done.wait [#allocation3], 2048  }
  0x23   :  { %493 = vsyncadd [#allocation3], 4294965248 }
  0x24   :  { %494 = dma.done.wait [#allocation5], 2048  }
  0x25   :  { %495 = vsyncadd [#allocation5], 4294965248  ;;  %v500_v0 = vmov 0   ;;  %v501_v1 = vmov 0.0|0.0   ;;  %v54_v2 = vld [vmem:[%s606_s0] sm:$0xff]  ;;  %v87_v4 = vld [vmem:[#allocation2 + $0x8] sm:$0xff] }
  0x26   :  { %446 = vset.pattern.permute.xlu0 %v500_v0  ;;  %389 = vmatprep.subr.bf16.mxu0 %v501_v1  ;;  %v86_v3 = vld [vmem:[#allocation2] sm:$0xff]  ;;  %v88_v6 = vld [vmem:[#allocation2 + $0x10] sm:$0xff]  ;;  %v89_v7 = vld [vmem:[#allocation2 + $0x18] sm:$0xff]  ;;  %v502_v11 = vmov 1   ;;  %vm503_vm0 = vmmov 0   ;;  %v504_v18 = vmov 0.0  }
  0x27   :  { %413 = vmatprep.subr.bf16.mxu1 %v501_v1  ;;  %59 = vperm.xlu0 %446, %v54_v2   ;;  %v390_v5 = vpack.c.bf16 %v87_v4, %v86_v3  ;;  %v393_v8 = vpack.c.bf16 %v89_v7, %v88_v6  ;;  %v90_v9 = vld [vmem:[#allocation2 + $0x20] sm:$0xff]  ;;  %v91_v10 = vld [vmem:[#allocation2 + $0x28] sm:$0xff]  ;;  %v92_v13 = vld [vmem:[#allocation2 + $0x30] sm:$0xff] }
  0x28   :  { %v396_v12 = vpack.c.bf16 %v91_v10, %v90_v9  ;;  %v93_v14 = vld [vmem:[#allocation2 + $0x38] sm:$0xff]  ;;  %v94_v16 = vld [vmem:[#allocation2 + $0x40] sm:$0xff]  ;;  %v95_v17 = vld [vmem:[#allocation2 + $0x48] sm:$0xff]  ;;  %351 = vmatprep.mubr.msk.f32.mxu0 %vm503_vm0, %v504_v18  ;;  %386 = vmatprep.mubr.msk.f32.mxu1 %vm503_vm0, %v504_v18 }
  0x29   :  { %391 = vmatpush3.bf16.msra.mxu0 %v390_v5  ;;  %v399_v15 = vpack.c.bf16 %v93_v14, %v92_v13  ;;  %v180_v19 = vld [vmem:[#allocation4] sm:$0xff]  ;;  %v181_v20 = vld [vmem:[#allocation4 + $0x8] sm:$0xff]  ;;  %v182_v21 = vld [vmem:[#allocation4 + $0x10] sm:$0xff]  ;;  %v402_v24 = vpack.c.bf16 %v95_v17, %v94_v16 }
  0x2a   :  { %392 = vmatprep.subr.bf16.mxu0 %v501_v1  ;;  %v414_v22 = vpack.c.bf16 %v181_v20, %v180_v19  ;;  %v183_v23 = vld [vmem:[#allocation4 + $0x18] sm:$0xff]  ;;  %v96_v25 = vld [vmem:[#allocation2 + $0x50] sm:$0xff]  ;;  %v184_v28 = vld [vmem:[#allocation4 + $0x20] sm:$0xff] }
  0x2b   :  { %447 = vset.pattern.permute.xlu0 %v502_v11  ;;  %v417_v26 = vpack.c.bf16 %v183_v23, %v182_v21  ;;  %v97_v27 = vld [vmem:[#allocation2 + $0x58] sm:$0xff]  ;;  %v185_v29 = vld [vmem:[#allocation4 + $0x28] sm:$0xff]  ;;  %v98_v31 = vld [vmem:[#allocation2 + $0x60] sm:$0xff] }
  0x2c   :  { %76 = vperm.xlu0 %447, %v54_v2   ;;  %415 = vmatpush3.bf16.msra.mxu1 %v414_v22  ;;  %v405_v30 = vpack.c.bf16 %v97_v27, %v96_v25  ;;  %v420_v32 = vpack.c.bf16 %v185_v29, %v184_v28  ;;  %v99_v33 = vld [vmem:[#allocation2 + $0x68] sm:$0xff]  ;;  %v186_v34 = vld [vmem:[#allocation4 + $0x30] sm:$0xff]  ;;  %v187_v35 = vld [vmem:[#allocation4 + $0x38] sm:$0xff] }
  0x2d   :  { %394 = vmatpush3.bf16.msra.mxu0 %v393_v8  ;;  %416 = vmatprep.subr.bf16.mxu1 %v501_v1  ;;  %v408_v36 = vpack.c.bf16 %v99_v33, %v98_v31  ;;  %v100_v37 = vld [vmem:[#allocation2 + $0x70] sm:$0xff]  ;;  %v423_v38 = vpack.c.bf16 %v187_v35, %v186_v34  ;;  %v101_v39 = vld [vmem:[#allocation2 + $0x78] sm:$0xff]  ;;  %v188_v40 = vld [vmem:[#allocation4 + $0x40] sm:$0xff] }
  0x2e   :  { %395 = vmatprep.subr.bf16.mxu0 %v501_v1  ;;  %v189_v41 = vld [vmem:[#allocation4 + $0x48] sm:$0xff]  ;;  %v411_v42 = vpack.c.bf16 %v101_v39, %v100_v37  ;;  %v190_v44 = vld [vmem:[#allocation4 + $0x50] sm:$0xff]  ;;  %v191_v45 = vld [vmem:[#allocation4 + $0x58] sm:$0xff] }
  0x2f   :  { %v426_v43 = vpack.c.bf16 %v189_v41, %v188_v40  ;;  %v429_v46 = vpack.c.bf16 %v191_v45, %v190_v44  ;;  %v192_v47 = vld [vmem:[#allocation4 + $0x60] sm:$0xff]  ;;  %v193_v48 = vld [vmem:[#allocation4 + $0x68] sm:$0xff]  ;;  %v194_v60 = vld [vmem:[#allocation4 + $0x70] sm:$0xff] }
  0x30   :  { %418 = vmatpush3.bf16.msra.mxu1 %v417_v26  ;;  %v432_v49 = vpack.c.bf16 %v193_v48, %v192_v47  ;;  %v280_v50 = vld [vmem:[%s607_s1] ss:$0 sm:$0xff]  ;;  %v282_v54 = vld [vmem:[%s607_s1 + $0x1] ss:$0 sm:$0xff]  ;;  %v195_v61 = vld [vmem:[#allocation4 + $0x78] sm:$0xff] }
  0x31   :  { %397 = vmatpush3.bf16.msra.mxu0 %v396_v12  ;;  %419 = vmatprep.subr.bf16.mxu1 %v501_v1  ;;  %v281_v53 = vld [vmem:[%s608_s2] ss:$0 sm:$0xff]  ;;  %v435_v62 = vpack.c.bf16 %v195_v61, %v194_v60 }
  0x32   :  { %398 = vmatprep.subr.bf16.mxu0 %v501_v1  ;;  %v283_v63 = vld [vmem:[%s610_s4] ss:$0 sm:$0xff] }
  0x33   :  { %v284_v4 = vld [vmem:[%s612_s6] ss:$0 sm:$0xff] }
  0x34   :  { %421 = vmatpush3.bf16.msra.mxu1 %v420_v32 }
  0x35   :  { %400 = vmatpush3.bf16.msra.mxu0 %v399_v15  ;;  %422 = vmatprep.subr.bf16.mxu1 %v501_v1 }
  0x36   :  { %401 = vmatprep.subr.bf16.mxu0 %v501_v1 }
  0x38   :  { %424 = vmatpush3.bf16.msra.mxu1 %v423_v38 }
  0x39   :  { %403 = vmatpush3.bf16.msra.mxu0 %v402_v24  ;;  %425 = vmatprep.subr.bf16.mxu1 %v501_v1 }
  0x3a   :  { %404 = vmatprep.subr.bf16.mxu0 %v501_v1 }
  0x3c   :  { %427 = vmatpush3.bf16.msra.mxu1 %v426_v43 }
  0x3d   :  { %406 = vmatpush3.bf16.msra.mxu0 %v405_v30  ;;  %428 = vmatprep.subr.bf16.mxu1 %v501_v1 }
  0x3e   :  { %407 = vmatprep.subr.bf16.mxu0 %v501_v1 }
  0x40   :  { %430 = vmatpush3.bf16.msra.mxu1 %v429_v46 }
  0x41   :  { %409 = vmatpush3.bf16.msra.mxu0 %v408_v36  ;;  %431 = vmatprep.subr.bf16.mxu1 %v501_v1 }
  0x42   :  { %410 = vmatprep.subr.bf16.mxu0 %v501_v1 }
  0x44   :  { %433 = vmatpush3.bf16.msra.mxu1 %v432_v49 }
  0x45   :  { %412 = vmatpush3.bf16.msra.mxu0 %v411_v42  ;;  %434 = vmatprep.subr.bf16.mxu1 %v501_v1 }
  0x48   :  { %436 = vmatpush3.bf16.msra.mxu1 %v435_v62 }
  0xa6   :  { %v60_v51 = vpop.permute.xlu0 %59 }
  0xa7   :  { %v66_v52 = vmul.f32 %v280_v50, %v60_v51 }
  0xa9   :  { %v73_v56 = vadd.f32 %v281_v53, %v66_v52 }
  0xab   :  { %v77_v55 = vpop.permute.xlu0 %76 }
  0xac   :  { %v83_v57 = vmul.f32 %v282_v54, %v77_v55 }
  0xae   :  { %v84_v58 = vadd.f32 %v83_v57, %v73_v56 }
  0xb0   :  { %v85_v59 = vmax.f32 %v84_v58, 0.0 }
  0xb2   :  { %352 = vmatmul.mubr.f32.vlgmr.msra.gmra.mrb[0].mxu0 %v85_v59 }
 0x185   :  { %v175_v0 = vpop.f32.mrb[0].mxu0 }
 0x186   :  { %v176_v1 = vadd.f32 %v283_v63, %v175_v0  ;;  %v353_v2 = vpop.f32.mrb[1].mxu0 }
 0x188   :  { %v179_v3 = vmax.f32 %v176_v1, 0.0 }
 0x18a   :  { %387 = vmatmul.mubr.f32.vlgmr.msra.gmra.mrb[0].mxu1 %v179_v3 }
 0x25d   :  { %v269_v5 = vpop.f32.mrb[0].mxu1 }
 0x25e   :  { %v270_v6 = vadd.f32 %v284_v4, %v269_v5  ;;  %v388_v7 = vpop.f32.mrb[1].mxu1 }
 0x260   :  { %273 = vst [vmem:[%s613_s7] sm:$0xff] %v270_v6 }
 0x261   :  { %278 = vsyncpa [#allocation3], 1 }
 0x262   :  { %279 = vsyncpa [#allocation5], 1 }

</bundles_post_ra>
